<compile_context>
chip_gen: v7x
topology: tpu7x:2x2x1
jax: 0.10.0
libtpu: 0.0.40
codegen_flags: <defaults>
</compile_context>

<pallas_src>
import functools

import jax
import jax.numpy as jnp
from jax.experimental import pallas as pl
from jax.experimental.pallas import tpu as pltpu


# --------------------------------------------------------------------------
# one decoder step (pure function of loaded VMEM tiles)
# --------------------------------------------------------------------------
def _decoder_step(emb, h, c, enc, w_att, v_row, w_pre, w_ctx, b_lstm,
                  wc_t, bc_row, *, hidden_size, seq_len):
    H, S = hidden_size, seq_len
    f32 = jnp.float32
    wd = w_att.dtype            # MXU input dtype (f32, or bf16 on v6e/v7x)

    # ---- Bahdanau attention: ONE fused MXU push for both projections ------
    # proj = tanh(enc @ We^T + h_prev @ Wh^T) = tanh([enc | h_bcast] @ w_att)
    lhs_att = jnp.concatenate(
        [enc.astype(wd), jnp.broadcast_to(h.astype(wd), (S, H))], axis=1)
    proj = jnp.tanh(jnp.dot(lhs_att, w_att, preferred_element_type=f32))   # (S,H)

    # ---- LSTM pre-matmul: operands ([emb | h_prev]) are known right now, so
    # this MXU push overlaps with the softmax / context VPU+EUP+XLU work.
    pre_in = jnp.concatenate([emb.astype(wd), h.astype(wd)], axis=1)       # (1,O+H)
    gates_pre = jnp.dot(pre_in, w_pre, preferred_element_type=f32)         # (1,4H)

    # ---- alignment scores + numerically-stable softmax (column form) ------
    scores = jnp.sum(proj * v_row.astype(f32), axis=1, keepdims=True)      # (S,1)
    m = jnp.max(scores, axis=0, keepdims=True)
    e = jnp.exp(scores - m)
    denom = jnp.sum(e, axis=0, keepdims=True)
    attn_col = e * pl.reciprocal(denom, approx=False)                      # (S,1)

    # context = sum_s attn_s * enc_s  (VPU multiply + sublane reduce, no MXU)
    context = jnp.sum(attn_col * enc.astype(f32), axis=0, keepdims=True)   # (1,H)

    # ---- finish the LSTM gates: only a K=H matmul on the critical path ----
    gates = (gates_pre
             + jnp.dot(context.astype(wd), w_ctx, preferred_element_type=f32)
             + b_lstm.astype(f32))                                         # (1,4H)
    sig = jax.nn.sigmoid(gates[:, :3 * H])          # one wide sigmoid slab
    i_g = sig[:, 0 * H:1 * H]
    f_g = sig[:, 1 * H:2 * H]
    o_g = sig[:, 2 * H:3 * H]
    g_g = jnp.tanh(gates[:, 3 * H:4 * H])
    c_new = f_g * c + i_g * g_g
    h_new = o_g * jnp.tanh(c_new)

    # ---- classifier --------------------------------------------------------
    logits = (jnp.dot(h_new.astype(wd), wc_t, preferred_element_type=f32)
              + bc_row.astype(f32))                                        # (1,O)

    # ---- lane-dense attention row: (S,1) column -> (1,S) row via a tiny
    # iota/select sublane reduction (VPU + XLU, off the critical path).
    eye = (jax.lax.broadcasted_iota(jnp.int32, (S, S), 0)
           == jax.lax.broadcasted_iota(jnp.int32, (S, S), 1))
    attn_row = jnp.sum(jnp.where(eye, attn_col, 0.0), axis=0, keepdims=True)

    return logits, h_new, c_new, attn_row


# --------------------------------------------------------------------------
# kernel: whole decode sequence (grid over time steps, state in VMEM scratch)
# --------------------------------------------------------------------------
def _bahdanau_seq_kernel(inp_ref, h0_ref, c0_ref, enc_ref, p_ref,
                         logits_ref, hn_ref, cn_ref, attn_ref,
                         h_scr, c_scr, *, hidden_size, output_size, seq_len,
                         offs):
    H, O, S = hidden_size, output_size, seq_len
    f32 = jnp.float32
    t = pl.program_id(0)

    @pl.when(t == 0)
    def _():
        h_scr[...] = h0_ref[...].astype(f32)
        c_scr[...] = c0_ref[...].astype(f32)

    # Static views into the single packed parameter slab (DMA'd once / call).
    ow, ov, opre, octx, ob, owc, obc = (
        offs["w_att"], offs["v"], offs["w_pre"], offs["w_ctx"],
        offs["b_lstm"], offs["wc_t"], offs["bc"])
    w_att = p_ref[ow:ow + 2 * H, 0:H]          # (2H, H)
    v_row = p_ref[ov:ov + 1, 0:H]              # (1, H)
    w_pre = p_ref[opre:opre + O + H, 0:4 * H]  # (O+H, 4H)
    w_ctx = p_ref[octx:octx + H, 0:4 * H]      # (H, 4H)
    b_lstm = p_ref[ob:ob + 1, 0:4 * H]         # (1, 4H)
    wc_t = p_ref[owc:owc + H, 0:O]             # (H, O)
    bc_row = p_ref[obc:obc + 1, 0:O]           # (1, O)

    emb = inp_ref[pl.ds(t, 1), :].astype(f32)  # (1, O) token for this step
    enc = enc_ref[...]                         # (S, H) resident for all steps
    h = h_scr[...]
    c = c_scr[...]

    logits, h_new, c_new, attn_row = _decoder_step(
        emb, h, c, enc, w_att, v_row, w_pre, w_ctx, b_lstm, wc_t, bc_row,
        hidden_size=H, seq_len=S)

    h_scr[...] = h_new
    c_scr[...] = c_new
    logits_ref[pl.ds(t, 1), :] = logits.astype(logits_ref.dtype)
    attn_ref[pl.ds(t, 1), :] = attn_row.astype(attn_ref.dtype)
    hn_ref[...] = h_new.astype(hn_ref.dtype)
    cn_ref[...] = c_new.astype(cn_ref.dtype)


# --------------------------------------------------------------------------
# one-time parameter packing (outside the hot path)
# --------------------------------------------------------------------------
def pack_bahdanau_params(fc_hidden_w, fc_encoder_w, attn_v,
                         w_ih, w_hh, b_ih, b_hh, w_cls, b_cls,
                         param_dtype=jnp.float32):
    """Packs all decoder parameters into one lane-padded (rows, 128k) slab.

    PyTorch shapes: fc_hidden_w / fc_encoder_w: (H, H); attn_v: (1, H);
    w_ih: (4H, O+H) [columns: emb | context]; w_hh: (4H, H); b_ih/b_hh: (4H,);
    w_cls: (O, H); b_cls: (O,).

    param_dtype=jnp.bfloat16 pre-casts the slab for bf16 MXU inputs
    (v6e/v7x); accumulation and all gate nonlinearities stay f32.
    """
    H = w_hh.shape[1]
    O = w_cls.shape[0]

    def reorder_gates(p):   # PyTorch [i, f, g, o] -> [i, f, o, g] along 4H
        return jnp.concatenate([p[:2 * H], p[3 * H:4 * H], p[2 * H:3 * H]],
                               axis=0)

    w_ih_r = reorder_gates(w_ih)                                # (4H, O+H)
    w_hh_r = reorder_gates(w_hh)                                # (4H, H)
    b_fused = reorder_gates(b_ih + b_hh).reshape(1, 4 * H)      # (1, 4H)

    w_att = jnp.concatenate([fc_encoder_w.T, fc_hidden_w.T], axis=0)  # (2H,H)
    v_row = attn_v.reshape(1, H)
    # Split fused LSTM weight: W_pre acts on [emb | h_prev], W_ctx on context.
    w_pre = jnp.concatenate([w_ih_r[:, :O].T, w_hh_r.T], axis=0)      # (O+H,4H)
    w_ctx = w_ih_r[:, O:].T                                           # (H,4H)
    wc_t = w_cls.T                                                    # (H,O)
    bc_row = b_cls.reshape(1, O)

    lanes = max(H, 4 * H, O)
    lanes = ((lanes + 127) // 128) * 128

    def a16(r):   # 16-row alignment keeps slices tile-aligned for f32 & bf16
        return ((r + 15) // 16) * 16

    sections = [("w_att", w_att), ("v", v_row), ("w_pre", w_pre),
                ("w_ctx", w_ctx), ("b_lstm", b_fused), ("wc_t", wc_t),
                ("bc", bc_row)]
    offs, pieces, row = {}, [], 0
    for name, arr in sections:
        offs[name] = row
        r, c = arr.shape
        piece = jnp.zeros((a16(r), lanes), jnp.float32)
        piece = piece.at[:r, :c].set(arr.astype(jnp.float32))
        pieces.append(piece)
        row += a16(r)
    slab = jnp.concatenate(pieces, axis=0).astype(param_dtype)

    return dict(slab=slab, offs=offs, hidden_size=H, output_size=O)


# --------------------------------------------------------------------------
# wrappers
# --------------------------------------------------------------------------
def bahdanau_decoder_decode(inputs_seq, hidden, encoder_outputs, packed):
    """Runs T decoder steps inside ONE kernel (teacher-forced inputs).

    Args:
      inputs_seq: (T, output_size) per-step decoder inputs.
      hidden: (h, c) tuple, each (1, 1, H) or (1, H).
      encoder_outputs: (1, S, H) or (S, H).
      packed: dict from pack_bahdanau_params().

    Returns:
      (logits (T, O), (h_n, c_n) each (1, 1, H), attn_weights (T, S))
    """
    h0, c0 = hidden
    H = packed["hidden_size"]
    O = packed["output_size"]
    slab = packed["slab"]
    offs = packed["offs"]

    enc = encoder_outputs.reshape(-1, H)        # (S, H)
    S = enc.shape[0]
    inputs_seq = inputs_seq.reshape(-1, O)      # (T, O)
    T = inputs_seq.shape[0]
    dtype = inputs_seq.dtype
    # TODO(synk): nn.Dropout(drop_prob) on `embedded` is treated as
    # inference-mode identity (no stochastic masking in the kernel).

    kernel = functools.partial(_bahdanau_seq_kernel, hidden_size=H,
                               output_size=O, seq_len=S, offs=offs)

    def full(shape):    # constant-index full-array block: DMA'd once per call
        return pl.BlockSpec(shape, lambda t: (0,) * len(shape))

    logits_seq, h_n, c_n, attn_seq = pl.pallas_call(
        kernel,
        grid=(T,),
        out_shape=(
            jax.ShapeDtypeStruct((T, O), dtype),
            jax.ShapeDtypeStruct((1, H), dtype),
            jax.ShapeDtypeStruct((1, H), dtype),
            jax.ShapeDtypeStruct((T, S), dtype),
        ),
        in_specs=[
            full((T, O)),          # per-step inputs (resident)
            full((1, H)),          # h0
            full((1, H)),          # c0
            full((S, H)),          # encoder outputs (resident)
            full(slab.shape),      # packed parameter slab (resident)
        ],
        out_specs=(full((T, O)), full((1, H)), full((1, H)), full((T, S))),
        scratch_shapes=[pltpu.VMEM((1, H), jnp.float32),
                        pltpu.VMEM((1, H), jnp.float32)],
        compiler_params=pltpu.CompilerParams(
            dimension_semantics=("arbitrary",)),
    )(inputs_seq, h0.reshape(1, H), c0.reshape(1, H), enc, slab)

    return logits_seq, (h_n[None], c_n[None]), attn_seq


def bahdanau_decoder_forward(inputs, hidden, encoder_outputs, packed):
    """Equivalent to BahdanauDecoder.forward (inference mode): T == 1 case."""
    logits, hidden_n, attn = bahdanau_decoder_decode(
        inputs.reshape(1, -1), hidden, encoder_outputs, packed)
    return logits, hidden_n, attn          # (1,O), ((1,1,H),(1,1,H)), (1,S)


# --------------------------------------------------------------------------
# pure-JAX reference of the PyTorch forward (for the parity check)
# --------------------------------------------------------------------------
def _reference_decoder(inputs, hidden, encoder_outputs,
                       fc_hidden_w, fc_encoder_w, attn_v,
                       w_ih, w_hh, b_ih, b_hh, w_cls, b_cls):
    h0, c0 = hidden
    H = w_hh.shape[1]
    enc = encoder_outputs.reshape(-1, H)
    emb = inputs.reshape(1, -1)
    h = h0.reshape(1, H)
    c = c0.reshape(1, H)

    x = jnp.tanh(h @ fc_hidden_w.T + enc @ fc_encoder_w.T)        # (S, H)
    scores = x @ attn_v.T                                         # (S, 1)
    attn = jax.nn.softmax(scores.reshape(1, -1), axis=1)          # (1, S)
    context = attn @ enc                                          # (1, H)
    lstm_in = jnp.concatenate([emb, context], axis=1)             # (1, O+H)
    gates = lstm_in @ w_ih.T + h @ w_hh.T + b_ih + b_hh
    i = jax.nn.sigmoid(gates[:, 0 * H:1 * H])
    f = jax.nn.sigmoid(gates[:, 1 * H:2 * H])
    g = jnp.tanh(gates[:, 2 * H:3 * H])
    o = jax.nn.sigmoid(gates[:, 3 * H:4 * H])
    c_n = f * c + i * g
    h_n = o * jnp.tanh(c_n)
    logits = h_n @ w_cls.T + b_cls
    return logits, (h_n[None], c_n[None]), attn


if __name__ == "__main__":
    # hidden_size, output_size, encoder seq_len, decode steps (batch = 1)
    H, O, S, T = 32, 16, 8, 6

    key = jax.random.PRNGKey(0)
    ks = jax.random.split(key, 14)
    bound = 1.0 / jnp.sqrt(jnp.float32(H))

    fc_hidden_w = jax.random.uniform(ks[0], (H, H), jnp.float32, -bound, bound)
    fc_encoder_w = jax.random.uniform(ks[1], (H, H), jnp.float32, -bound, bound)
    attn_v = jax.random.normal(ks[2], (1, H), jnp.float32) * 0.1
    w_ih = jax.random.uniform(ks[3], (4 * H, H + O), jnp.float32, -bound, bound)
    w_hh = jax.random.uniform(ks[4], (4 * H, H), jnp.float32, -bound, bound)
    b_ih = jax.random.uniform(ks[5], (4 * H,), jnp.float32, -bound, bound)
    b_hh = jax.random.uniform(ks[6], (4 * H,), jnp.float32, -bound, bound)
    w_cls = jax.random.uniform(ks[7], (O, H), jnp.float32, -bound, bound)
    b_cls = jax.random.uniform(ks[8], (O,), jnp.float32, -bound, bound)

    inputs = jax.random.normal(ks[9], (1, O), jnp.float32)        # single step
    encoder_outputs = jax.random.normal(ks[10], (1, S, H), jnp.float32)
    h0 = jax.random.normal(ks[11], (1, 1, H), jnp.float32) * 0.1
    c0 = jax.random.normal(ks[12], (1, 1, H), jnp.float32) * 0.1
    inputs_seq = jax.random.normal(ks[13], (T, O), jnp.float32)   # T steps

    packed = pack_bahdanau_params(fc_hidden_w, fc_encoder_w, attn_v,
                                  w_ih, w_hh, b_ih, b_hh, w_cls, b_cls)

    # -------- references (PyTorch-forward replica, stepped in Python) ------
    ref_args = (fc_hidden_w, fc_encoder_w, attn_v,
                w_ih, w_hh, b_ih, b_hh, w_cls, b_cls)
    r_logits, (r_h, r_c), r_attn = _reference_decoder(
        inputs, (h0, c0), encoder_outputs, *ref_args)

    rh, rc = h0, c0
    ref_logits_seq, ref_attn_seq = [], []
    for t in range(T):
        lg, (rh, rc), at = _reference_decoder(
            inputs_seq[t:t + 1], (rh, rc), encoder_outputs, *ref_args)
        ref_logits_seq.append(lg)
        ref_attn_seq.append(at)
    ref_logits_seq = jnp.concatenate(ref_logits_seq, axis=0)      # (T, O)
    ref_attn_seq = jnp.concatenate(ref_attn_seq, axis=0)          # (T, S)

    # -------- single step: matches BahdanauDecoder.forward -----------------
    logits, (h_n, c_n), attn_w = bahdanau_decoder_forward(
        inputs, (h0, c0), encoder_outputs, packed)
    logits = jax.block_until_ready(logits)
    assert jnp.allclose(logits, r_logits, atol=1e-4, rtol=1e-4)
    assert jnp.allclose(h_n, r_h, atol=1e-4, rtol=1e-4)
    assert jnp.allclose(c_n, r_c, atol=1e-4, rtol=1e-4)
    assert jnp.allclose(attn_w, r_attn, atol=1e-4, rtol=1e-4)

    # -------- full sequence: decode loop inside ONE kernel launch ----------
    logits_seq, (h_T, c_T), attn_seq = bahdanau_decoder_decode(
        inputs_seq, (h0, c0), encoder_outputs, packed)
    logits_seq = jax.block_until_ready(logits_seq)
    attn_seq = jax.block_until_ready(attn_seq)
    assert jnp.allclose(logits_seq, ref_logits_seq, atol=2e-4, rtol=2e-4)
    assert jnp.allclose(attn_seq, ref_attn_seq, atol=2e-4, rtol=2e-4)
    assert jnp.allclose(h_T, rh, atol=2e-4, rtol=2e-4)
    assert jnp.allclose(c_T, rc, atol=2e-4, rtol=2e-4)

    print("KERNEL_OK")
</pallas_src>

<mosaic_0001>
module attributes {stable_mosaic.version = 11 : i64} {
  func.func @_bahdanau_seq_kernel(%arg0: i32, %arg1: memref<1x16xf32, #tpu.memory_space<vmem>>, %arg2: memref<1x32xf32, #tpu.memory_space<vmem>>, %arg3: memref<1x32xf32, #tpu.memory_space<vmem>>, %arg4: memref<8x32xf32, #tpu.memory_space<vmem>>, %arg5: memref<224x128xf32, #tpu.memory_space<vmem>>, %arg6: memref<1x16xf32, #tpu.memory_space<vmem>>, %arg7: memref<1x32xf32, #tpu.memory_space<vmem>>, %arg8: memref<1x32xf32, #tpu.memory_space<vmem>>, %arg9: memref<1x8xf32, #tpu.memory_space<vmem>>, %arg10: memref<1x32xf32, #tpu.memory_space<vmem>>, %arg11: memref<1x32xf32, #tpu.memory_space<vmem>>) attributes {dimension_semantics = [#tpu.dimension_semantics<arbitrary>], iteration_bounds = array<i64: 1>, scalar_prefetch = 0 : i64, scratch_operands = 2 : i64, tpu.core_type = #tpu.core_type<tc>, window_params = [{pipeline_mode = #tpu.pipeline_mode<synchronous>, transform_indices = @transform_0, window_bounds = array<i64: 1, 16>}, {pipeline_mode = #tpu.pipeline_mode<synchronous>, transform_indices = @transform_1, window_bounds = array<i64: 1, 32>}, {pipeline_mode = #tpu.pipeline_mode<synchronous>, transform_indices = @transform_2, window_bounds = array<i64: 1, 32>}, {pipeline_mode = #tpu.pipeline_mode<synchronous>, transform_indices = @transform_3, window_bounds = array<i64: 8, 32>}, {pipeline_mode = #tpu.pipeline_mode<synchronous>, transform_indices = @transform_4, window_bounds = array<i64: 224, 128>}, {pipeline_mode = #tpu.pipeline_mode<synchronous>, transform_indices = @transform_5, window_bounds = array<i64: 1, 16>}, {pipeline_mode = #tpu.pipeline_mode<synchronous>, transform_indices = @transform_6, window_bounds = array<i64: 1, 32>}, {pipeline_mode = #tpu.pipeline_mode<synchronous>, transform_indices = @transform_7, window_bounds = array<i64: 1, 32>}, {pipeline_mode = #tpu.pipeline_mode<synchronous>, transform_indices = @transform_8, window_bounds = array<i64: 1, 8>}]} {
    %c0_i32 = arith.constant 0 : i32
    %0 = arith.cmpi eq, %arg0, %c0_i32 : i32
    %1 = arith.extui %0 : i1 to i32
    %c0_i32_0 = arith.constant 0 : i32
    %2 = arith.cmpi ne, %1, %c0_i32_0 : i32
    scf.if %2 {
      %c0_35 = arith.constant 0 : index
      %c0_36 = arith.constant 0 : index
      %78 = vector.load %arg2[%c0_35, %c0_36] : memref<1x32xf32, #tpu.memory_space<vmem>>, vector<1x32xf32>
      %c0_37 = arith.constant 0 : index
      %c0_38 = arith.constant 0 : index
      %79 = vector.load %arg10[%c0_37, %c0_38] : memref<1x32xf32, #tpu.memory_space<vmem>>, vector<1x32xf32>
      tpu.vector_store %arg10[%c0_37, %c0_38], %78 {strides = array<i32>} : memref<1x32xf32, #tpu.memory_space<vmem>>, vector<1x32xf32>,
      %c0_39 = arith.constant 0 : index
      %c0_40 = arith.constant 0 : index
      %80 = vector.load %arg3[%c0_39, %c0_40] : memref<1x32xf32, #tpu.memory_space<vmem>>, vector<1x32xf32>
      %c0_41 = arith.constant 0 : index
      %c0_42 = arith.constant 0 : index
      %81 = vector.load %arg11[%c0_41, %c0_42] : memref<1x32xf32, #tpu.memory_space<vmem>>, vector<1x32xf32>
      tpu.vector_store %arg11[%c0_41, %c0_42], %80 {strides = array<i32>} : memref<1x32xf32, #tpu.memory_space<vmem>>, vector<1x32xf32>,
    } else {
    }
    %c0 = arith.constant 0 : index
    %c0_1 = arith.constant 0 : index
    %3 = vector.load %arg5[%c0, %c0_1] : memref<224x128xf32, #tpu.memory_space<vmem>>, vector<64x32xf32>
    %c64 = arith.constant 64 : index
    %c0_2 = arith.constant 0 : index
    %4 = vector.load %arg5[%c64, %c0_2] : memref<224x128xf32, #tpu.memory_space<vmem>>, vector<1x32xf32>
    %c80 = arith.constant 80 : index
    %c0_3 = arith.constant 0 : index
    %5 = vector.load %arg5[%c80, %c0_3] : memref<224x128xf32, #tpu.memory_space<vmem>>, vector<48x128xf32>
    %c128 = arith.constant 128 : index
    %c0_4 = arith.constant 0 : index
    %6 = vector.load %arg5[%c128, %c0_4] : memref<224x128xf32, #tpu.memory_space<vmem>>, vector<32x128xf32>
    %c160 = arith.constant 160 : index
    %c0_5 = arith.constant 0 : index
    %7 = vector.load %arg5[%c160, %c0_5] : memref<224x128xf32, #tpu.memory_space<vmem>>, vector<1x128xf32>
    %c176 = arith.constant 176 : index
    %c0_6 = arith.constant 0 : index
    %8 = vector.load %arg5[%c176, %c0_6] : memref<224x128xf32, #tpu.memory_space<vmem>>, vector<32x16xf32>
    %c208 = arith.constant 208 : index
    %c0_7 = arith.constant 0 : index
    %9 = vector.load %arg5[%c208, %c0_7] : memref<224x128xf32, #tpu.memory_space<vmem>>, vector<1x16xf32>
    %10 = arith.index_cast %arg0 : i32 to index
    %c0_8 = arith.constant 0 : index
    %11 = vector.load %arg1[%10, %c0_8] : memref<1x16xf32, #tpu.memory_space<vmem>>, vector<1x16xf32>
    %c0_9 = arith.constant 0 : index
    %c0_10 = arith.constant 0 : index
    %12 = vector.load %arg4[%c0_9, %c0_10] : memref<8x32xf32, #tpu.memory_space<vmem>>, vector<8x32xf32>
    %c0_11 = arith.constant 0 : index
    %c0_12 = arith.constant 0 : index
    %13 = vector.load %arg10[%c0_11, %c0_12] : memref<1x32xf32, #tpu.memory_space<vmem>>, vector<1x32xf32>
    %c0_13 = arith.constant 0 : index
    %c0_14 = arith.constant 0 : index
    %14 = vector.load %arg11[%c0_13, %c0_14] : memref<1x32xf32, #tpu.memory_space<vmem>>, vector<1x32xf32>
    %15 = vector.shape_cast %13 : vector<1x32xf32> to vector<1x32xf32>
    %16 = vector.broadcast %15 : vector<1x32xf32> to vector<8x32xf32>
    %17 = tpu.concatenate %12, %16 in 1 : vector<8x32xf32>, vector<8x32xf32> -> vector<8x64xf32>
    %cst = arith.constant dense<0.000000e+00> : vector<8x32xf32>
    %18 = tpu.matmul %17, %3, %cst {dimension_numbers = #tpu.dot_dimension_numbers<[1], [0], [0], [1], [0, 0, 1, 1], [], []>} : vector<8x64xf32>, vector<64x32xf32>, vector<8x32xf32> -> vector<8x32xf32>
    %19 = math.tanh %18 : vector<8x32xf32>
    %20 = tpu.concatenate %11, %13 in 1 : vector<1x16xf32>, vector<1x32xf32> -> vector<1x48xf32>
    %cst_15 = arith.constant dense<0.000000e+00> : vector<1x128xf32>
    %21 = tpu.matmul %20, %5, %cst_15 {dimension_numbers = #tpu.dot_dimension_numbers<[1], [0], [0], [1], [0, 0, 1, 1], [], []>} : vector<1x48xf32>, vector<48x128xf32>, vector<1x128xf32> -> vector<1x128xf32>
    %22 = vector.broadcast %4 : vector<1x32xf32> to vector<8x32xf32>
    %23 = arith.mulf %19, %22 : vector<8x32xf32>
    %cst_16 = arith.constant dense<0.000000e+00> : vector<8xf32>
    %24 = vector.multi_reduction <add>, %23, %cst_16 [1] : vector<8x32xf32> to vector<8xf32>
    %25 = vector.shape_cast %24 : vector<8xf32> to vector<8x1xf32>
    %cst_17 = arith.constant dense<0xFF800000> : vector<1xf32>
    %26 = vector.multi_reduction <maximumf>, %25, %cst_17 [0] : vector<8x1xf32> to vector<1xf32>
    %27 = vector.shape_cast %26 : vector<1xf32> to vector<1x1xf32>
    %28 = vector.broadcast %27 : vector<1x1xf32> to vector<8x1xf32>
    %29 = arith.subf %25, %28 : vector<8x1xf32>
    %30 = math.exp %29 : vector<8x1xf32>
    %cst_18 = arith.constant dense<0.000000e+00> : vector<1xf32>
    %31 = vector.multi_reduction <add>, %30, %cst_18 [0] : vector<8x1xf32> to vector<1xf32>
    %32 = vector.shape_cast %31 : vector<1xf32> to vector<1x1xf32>
    %33 = tpu.reciprocal %32 : vector<1x1xf32> -> vector<1x1xf32>
    %34 = vector.broadcast %33 : vector<1x1xf32> to vector<8x1xf32>
    %35 = arith.mulf %30, %34 : vector<8x1xf32>
    %36 = vector.broadcast %35 : vector<8x1xf32> to vector<8x32xf32>
    %37 = arith.mulf %36, %12 : vector<8x32xf32>
    %cst_19 = arith.constant dense<0.000000e+00> : vector<32xf32>
    %38 = vector.multi_reduction <add>, %37, %cst_19 [0] : vector<8x32xf32> to vector<32xf32>
    %39 = vector.shape_cast %38 : vector<32xf32> to vector<1x32xf32>
    %cst_20 = arith.constant dense<0.000000e+00> : vector<1x128xf32>
    %40 = tpu.matmul %39, %6, %cst_20 {dimension_numbers = #tpu.dot_dimension_numbers<[1], [0], [0], [1], [0, 0, 1, 1], [], []>} : vector<1x32xf32>, vector<32x128xf32>, vector<1x128xf32> -> vector<1x128xf32>
    %41 = arith.addf %21, %40 : vector<1x128xf32>
    %42 = arith.addf %41, %7 : vector<1x128xf32>
    %43 = vector.extract_strided_slice %42 {offsets = [0, 0], sizes = [1, 96], strides = [1, 1]} : vector<1x128xf32> to vector<1x96xf32>
    %44 = arith.negf %43 : vector<1x96xf32>
    %45 = math.exp %44 : vector<1x96xf32>
    %cst_21 = arith.constant 1.000000e+00 : f32
    %46 = vector.broadcast %cst_21 : f32 to vector<1x96xf32>
    %47 = arith.addf %46, %45 : vector<1x96xf32>
    %48 = arith.divf %46, %47 : vector<1x96xf32>
    %49 = vector.extract_strided_slice %48 {offsets = [0, 0], sizes = [1, 32], strides = [1, 1]} : vector<1x96xf32> to vector<1x32xf32>
    %50 = vector.extract_strided_slice %48 {offsets = [0, 32], sizes = [1, 32], strides = [1, 1]} : vector<1x96xf32> to vector<1x32xf32>
    %51 = vector.extract_strided_slice %48 {offsets = [0, 64], sizes = [1, 32], strides = [1, 1]} : vector<1x96xf32> to vector<1x32xf32>
    %52 = vector.extract_strided_slice %42 {offsets = [0, 96], sizes = [1, 32], strides = [1, 1]} : vector<1x128xf32> to vector<1x32xf32>
    %53 = math.tanh %52 : vector<1x32xf32>
    %54 = arith.mulf %50, %14 : vector<1x32xf32>
    %55 = arith.mulf %49, %53 : vector<1x32xf32>
    %56 = arith.addf %54, %55 : vector<1x32xf32>
    %57 = math.tanh %56 : vector<1x32xf32>
    %58 = arith.mulf %51, %57 : vector<1x32xf32>
    %cst_22 = arith.constant dense<0.000000e+00> : vector<1x16xf32>
    %59 = tpu.matmul %58, %8, %cst_22 {dimension_numbers = #tpu.dot_dimension_numbers<[1], [0], [0], [1], [0, 0, 1, 1], [], []>} : vector<1x32xf32>, vector<32x16xf32>, vector<1x16xf32> -> vector<1x16xf32>
    %60 = arith.addf %59, %9 : vector<1x16xf32>
    %61 = tpu.iota {dimensions = array<i32: 0>} : vector<8x8xi32>
    %62 = tpu.iota {dimensions = array<i32: 1>} : vector<8x8xi32>
    %63 = arith.cmpi eq, %61, %62 : vector<8x8xi32>
    %cst_23 = arith.constant 0.000000e+00 : f32
    %64 = vector.shape_cast %35 : vector<8x1xf32> to vector<8x1xf32>
    %65 = vector.broadcast %64 : vector<8x1xf32> to vector<8x8xf32>
    %66 = vector.broadcast %cst_23 : f32 to vector<8x8xf32>
    %67 = arith.select %63, %65, %66 : vector<8x8xi1>, vector<8x8xf32>
    %cst_24 = arith.constant dense<0.000000e+00> : vector<8xf32>
    %68 = vector.multi_reduction <add>, %67, %cst_24 [0] : vector<8x8xf32> to vector<8xf32>
    %69 = vector.shape_cast %68 : vector<8xf32> to vector<1x8xf32>
    %c0_25 = arith.constant 0 : index
    %c0_26 = arith.constant 0 : index
    %70 = vector.load %arg10[%c0_25, %c0_26] : memref<1x32xf32, #tpu.memory_space<vmem>>, vector<1x32xf32>
    tpu.vector_store %arg10[%c0_25, %c0_26], %58 {strides = array<i32>} : memref<1x32xf32, #tpu.memory_space<vmem>>, vector<1x32xf32>,
    %c0_27 = arith.constant 0 : index
    %c0_28 = arith.constant 0 : index
    %71 = vector.load %arg11[%c0_27, %c0_28] : memref<1x32xf32, #tpu.memory_space<vmem>>, vector<1x32xf32>
    tpu.vector_store %arg11[%c0_27, %c0_28], %56 {strides = array<i32>} : memref<1x32xf32, #tpu.memory_space<vmem>>, vector<1x32xf32>,
    %72 = arith.index_cast %arg0 : i32 to index
    %c0_29 = arith.constant 0 : index
    %73 = vector.load %arg6[%72, %c0_29] : memref<1x16xf32, #tpu.memory_space<vmem>>, vector<1x16xf32>
    tpu.vector_store %arg6[%72, %c0_29], %60 {strides = array<i32>} : memref<1x16xf32, #tpu.memory_space<vmem>>, vector<1x16xf32>,
    %74 = arith.index_cast %arg0 : i32 to index
    %c0_30 = arith.constant 0 : index
    %75 = vector.load %arg9[%74, %c0_30] : memref<1x8xf32, #tpu.memory_space<vmem>>, vector<1x8xf32>
    tpu.vector_store %arg9[%74, %c0_30], %69 {strides = array<i32>} : memref<1x8xf32, #tpu.memory_space<vmem>>, vector<1x8xf32>,
    %c0_31 = arith.constant 0 : index
    %c0_32 = arith.constant 0 : index
    %76 = vector.load %arg7[%c0_31, %c0_32] : memref<1x32xf32, #tpu.memory_space<vmem>>, vector<1x32xf32>
    tpu.vector_store %arg7[%c0_31, %c0_32], %58 {strides = array<i32>} : memref<1x32xf32, #tpu.memory_space<vmem>>, vector<1x32xf32>,
    %c0_33 = arith.constant 0 : index
    %c0_34 = arith.constant 0 : index
    %77 = vector.load %arg8[%c0_33, %c0_34] : memref<1x32xf32, #tpu.memory_space<vmem>>, vector<1x32xf32>
    tpu.vector_store %arg8[%c0_33, %c0_34], %56 {strides = array<i32>} : memref<1x32xf32, #tpu.memory_space<vmem>>, vector<1x32xf32>,
    return
  }
  func.func @transform_0(%arg0: i32) -> (i32, i32) {
    %c0_i32 = arith.constant 0 : i32
    %c0_i32_0 = arith.constant 0 : i32
    %c0_i32_1 = arith.constant 0 : i32
    return %c0_i32, %c0_i32_0 : i32, i32
  }
  func.func @transform_1(%arg0: i32) -> (i32, i32) {
    %c0_i32 = arith.constant 0 : i32
    %c0_i32_0 = arith.constant 0 : i32
    %c0_i32_1 = arith.constant 0 : i32
    return %c0_i32, %c0_i32_0 : i32, i32
  }
  func.func @transform_2(%arg0: i32) -> (i32, i32) {
    %c0_i32 = arith.constant 0 : i32
    %c0_i32_0 = arith.constant 0 : i32
    %c0_i32_1 = arith.constant 0 : i32
    return %c0_i32, %c0_i32_0 : i32, i32
  }
  func.func @transform_3(%arg0: i32) -> (i32, i32) {
    %c0_i32 = arith.constant 0 : i32
    %c0_i32_0 = arith.constant 0 : i32
    %c0_i32_1 = arith.constant 0 : i32
    return %c0_i32, %c0_i32_0 : i32, i32
  }
  func.func @transform_4(%arg0: i32) -> (i32, i32) {
    %c0_i32 = arith.constant 0 : i32
    %c0_i32_0 = arith.constant 0 : i32
    %c0_i32_1 = arith.constant 0 : i32
    return %c0_i32, %c0_i32_0 : i32, i32
  }
  func.func @transform_5(%arg0: i32) -> (i32, i32) {
    %c0_i32 = arith.constant 0 : i32
    %c0_i32_0 = arith.constant 0 : i32
    %c0_i32_1 = arith.constant 0 : i32
    return %c0_i32, %c0_i32_0 : i32, i32
  }
  func.func @transform_6(%arg0: i32) -> (i32, i32) {
    %c0_i32 = arith.constant 0 : i32
    %c0_i32_0 = arith.constant 0 : i32
    %c0_i32_1 = arith.constant 0 : i32
    return %c0_i32, %c0_i32_0 : i32, i32
  }
  func.func @transform_7(%arg0: i32) -> (i32, i32) {
    %c0_i32 = arith.constant 0 : i32
    %c0_i32_0 = arith.constant 0 : i32
    %c0_i32_1 = arith.constant 0 : i32
    return %c0_i32, %c0_i32_0 : i32, i32
  }
  func.func @transform_8(%arg0: i32) -> (i32, i32) {
    %c0_i32 = arith.constant 0 : i32
    %c0_i32_0 = arith.constant 0 : i32
    %c0_i32_1 = arith.constant 0 : i32
    return %c0_i32, %c0_i32_0 : i32, i32
  }
}

</mosaic_0001>

<bundles_post_ra>
// kernel: tpu_custom_call.1
= control target key start
LH: loop header
LB: loop body
LE: loop exit
PB: predicated region body
PF: predicated region fallthrough
CT: control target
= control target key end

     0   :  { %14 = vsyncpa [#allocation5], 0  ;;  %s1031_s0 = inlined_call_operand.hbm [shape: f32[1,16], index: 0, kind: input, shape index: {}]   ;;  %s1032_s1 = inlined_call_operand.vmem [shape: f32[1,32], index: 1, kind: input, shape index: {}]   ;;  %s1033_s2 = inlined_call_operand.vmem [shape: f32[1,32], index: 2, kind: input, shape index: {}]   ;;  %s1034_s3 = inlined_call_operand.vmem [shape: f32[8,32], index: 3, kind: input, shape index: {}]   ;;  %s1035_s4 = inlined_call_operand.hbm [shape: f32[224,128], index: 4, kind: input, shape index: {}]   ;;  %s1036_s5 = inlined_call_operand.hbm [shape: f32[1,16], index: 5, kind: output, shape index: {0}]   ;;  %s1037_s6 = inlined_call_operand.hbm [shape: f32[1,32], index: 6, kind: output, shape index: {1}]   ;;  %s1038_s7 = inlined_call_operand.hbm [shape: f32[1,32], index: 7, kind: output, shape index: {2}]   ;;  %s1039_s8 = inlined_call_operand.hbm [shape: f32[1,8], index: 8, kind: output, shape index: {3}]  }
   0x1   :  { %15 = vsyncpa [#allocation8], 0 }
   0x2   :  { %16 = vsyncpa [#allocation6], 0 }
   0x3   :  { %17 = vsyncpa [#allocation11], 0 }
   0x4   :  { %18 = vsyncpa [#allocation14], 0  ;;  %s848_s27 = smov [#allocation4]   ;;  %s849_s29 = smov [#allocation7]  }
   0x5   :  { %s25_s28 = sshll.u32 %s848_s27, 4  ;;  %s40_s30 = sshll.u32 %s849_s29, 4  ;;  %s26_s28 = int_to_ptr.vmem [resolvable:$true] %s25_s28  ;;  %s908_s30 = int_to_ptr.vmem [resolvable:$true] %s40_s30 }
   0x6   :  { %s706_s11 = scalar_lea.hbm %s1031_s0, 16 }
   0x7   :  { %p707_p0 = scmp.ne.s32.totalorder %s1031_s0, %s706_s11  ;;  %p710_p1 = scmp.lt.u32.totalorder %s706_s11, %s1031_s0 }
   0x9   :  { %p712_p2 = pnand %p710_p1, %p707_p0 }
   0xb   :  { %715 = shalt.err (!%p712_p2)
}
   0xc   :  { %s716_s16 = scalar_lea.vmem %s26_s28, 16  ;;  %s720_s17 = scalar_lea.vmem %s26_s28, 32 }
   0xd   :  { %p717_p3 = scmp.ne.s32.totalorder %s26_s28, %s716_s16  ;;  %p721_p4 = scmp.lt.s32.totalorder %s26_s28, %s26_s28 }
   0xe   :  { %p722_p5 = scmp.lt.s32.totalorder %s720_s17, %s716_s16 }
  0x10   :  { %p723_p6 = por %p722_p5, %p721_p4 }
  0x12   :  { %p724_p7 = pnand %p723_p6, %p717_p3 }
  0x14   :  { %727 = shalt.err (!%p724_p7)
}
  0x15   :  { %28 = dma.hbm_to_vmem [thread:$0]  %s1031_s0, 16, %s26_s28, [#allocation5]  }
  0x16   :  { %s728_s22 = scalar_lea.hbm %s1035_s4, 3584 }
  0x17   :  { %p729_p8 = scmp.ne.s32.totalorder %s1035_s4, %s728_s22  ;;  %p732_p9 = scmp.lt.u32.totalorder %s728_s22, %s1035_s4 }
  0x19   :  { %p734_p10 = pnand %p732_p9, %p729_p8 }
  0x1b   :  { %737 = shalt.err (!%p734_p10)
}
  0x1c   :  { %s738_s27 = scalar_lea.vmem %s908_s30, 3584  ;;  %p743_p12 = scmp.lt.s32.totalorder %s908_s30, %s908_s30 }
  0x1d   :  { %p739_p11 = scmp.ne.s32.totalorder %s908_s30, %s738_s27  ;;  %p744_p13 = scmp.lt.s32.totalorder %s738_s27, %s738_s27 }
  0x1f   :  { %p745_p0 = por %p744_p13, %p743_p12 }
  0x21   :  { %p746_p1 = pnand %p745_p0, %p739_p11 }
  0x23   :  { %749 = shalt.err (!%p746_p1)
}
  0x24   :  { %s850_s0 = smov 128   ;;  %s851_s28 = smov 8  }
  0x25   :  { %46 = dma.hbm_to_vmem [thread:$0]  %s1035_s4, 3584, %s908_s30, [#allocation8], %s850_s0, %s850_s0, %s851_s28  }
  0x26   :  { %838 = dma.done.wait [#allocation5], 16  }
  0x27   :  { %839 = vsyncadd [#allocation5], 4294967280 }
  0x28   :  { %840 = dma.done.wait [#allocation8], 3584  }
  0x29   :  { %841 = vsyncadd [#allocation8], 4294963712  ;;  %v852_v0 = vmov 0.0|0.0   ;;  %vm853_vm0 = vmmov 0   ;;  %v854_v1 = vmov 0.0   ;;  %vm58_vm1 = vcmask 253952  }
  0x2a   :  { %644 = vmatprep.subr.bf16.mxu0 %v852_v0  ;;  %656 = vmatprep.subr.bf16.mxu1 %v852_v0  ;;  %v57_v2 = vld [vmem:[%s1032_s1] sm:$0x1]  ;;  %v62_v3 = vld [vmem:[#allocation7] sm:$0xff]  ;;  %v63_v4 = vld [vmem:[#allocation7 + $0x8] sm:$0xff]  ;;  %s855_s1 = smov 32   ;;  %vm99_vm2 = vcmask 261120   ;;  %v469_v47 = vlaneseq }
  0x2b   :  { %604 = vmatprep.mubr.msk.f32.mxu0 %vm853_vm0, %v854_v1  ;;  %615 = vmatprep.mubr.msk.f32.mxu1 %vm853_vm0, %v854_v1  ;;  %59 = vst.msk [vmem:[#allocation2] sm:$0x1] %vm58_vm1, %v57_v2  ;;  %v645_v5 = vpack.c.bf16 %v63_v4, %v62_v3  ;;  %v64_v6 = vld [vmem:[#allocation7 + $0x10] sm:$0xff]  ;;  %v65_v7 = vld [vmem:[#allocation7 + $0x18] sm:$0xff]  ;;  %v66_v9 = vld [vmem:[#allocation7 + $0x20] sm:$0xff]  ;;  %vm101_vm3 = vcmask 523264  }
  0x2c   :  { %v648_v8 = vpack.c.bf16 %v65_v7, %v64_v6  ;;  %v67_v10 = vld [vmem:[#allocation7 + $0x28] sm:$0xff]  ;;  %v68_v13 = vld [vmem:[#allocation7 + $0x30] sm:$0xff]  ;;  %v69_v14 = vld [vmem:[#allocation7 + $0x38] sm:$0xff]  ;;  %s856_s12 = smov 16   ;;  %v470_v48 = vshrl.u32 %v469_v47, 7  ;;  %v472_v49 = vand.u32 127, %v469_v47 }
  0x2d   :  { %646 = vmatpush3.bf16.msra.mxu0 %v645_v5  ;;  %v651_v11 = vpack.c.bf16 %v67_v10, %v66_v9  ;;  %v654_v15 = vpack.c.bf16 %v69_v14, %v68_v13  ;;  %v88_v16 = vld [vmem:[%s1034_s3] sm:$0xff]  ;;  %v556_v21 = vld [vmem:[#allocation7 + $0x40] ss:$0 sm:$0xff]  ;;  %v78_v26 = vld [vmem:[#allocation7 + $0x88] sm:$0xff]  ;;  %vm475_vm5 = vcmask 64512   ;;  %vm493_vm6 = vcmask 57344  }
  0x2e   :  { %647 = vmatprep.subr.bf16.mxu0 %v852_v0  ;;  %v77_v25 = vld [vmem:[#allocation7 + $0x80] sm:$0xff]  ;;  %v79_v27 = vld [vmem:[#allocation7 + $0x90] sm:$0xff]  ;;  %v80_v29 = vld [vmem:[#allocation7 + $0x98] sm:$0xff]  ;;  %vm473_vm4 = vcmp.eq.s32.totalorder %v470_v48, %v472_v49  ;;  %vm179_vm7 = vcmask 130048   ;;  %vm287_vm8 = vcmask 392192   ;;  %s858_s14 = smov 96  }
  0x2f   :  { %v657_v28 = vpack.c.bf16 %v78_v26, %v77_v25  ;;  %v660_v30 = vpack.c.bf16 %v80_v29, %v79_v27  ;;  %v71_v2 = vld [vmem:[#allocation7 + $0x50] sm:$0xff]  ;;  %v72_v3 = vld [vmem:[#allocation7 + $0x58] sm:$0xff]  ;;  %v73_v9 = vld [vmem:[#allocation7 + $0x60] sm:$0xff]  ;;  %s859_s15 = smov [#allocation10]  }
  0x30   :  { %v663_v6 = vpack.c.bf16 %v72_v3, %v71_v2  ;;  %v74_v10 = vld [vmem:[#allocation7 + $0x68] sm:$0xff]  ;;  %v76_v13 = vld [vmem:[#allocation7 + $0x78] sm:$0xff]  ;;  %s513_s16 = sshll.u32 %s859_s15, 4  ;;  %s514_s16 = int_to_ptr.vmem [resolvable:$true] %s513_s16 }
  0x31   :  { %649 = vmatpush3.bf16.msra.mxu0 %v648_v8  ;;  %658 = vmatpush3.bf16.msra.mxu1 %v657_v28  ;;  %s750_s17 = scalar_lea.vmem %s514_s16, 16  ;;  %s754_s18 = scalar_lea.vmem %s514_s16, 32 }
  0x32   :  { %v554_v12 = vld [vmem:[#allocation2] ss:$0 sm:$0xff]  ;;  %650 = vmatprep.subr.bf16.mxu0 %v852_v0  ;;  %659 = vmatprep.subr.bf16.mxu1 %v852_v0  ;;  %p751_p2 = scmp.ne.s32.totalorder %s514_s16, %s750_s17  ;;  %p755_p3 = scmp.lt.s32.totalorder %s514_s16, %s514_s16 }
  0x33   :  { %96 = vrot.lane.b32.xlu0 %v554_v12, %s855_s1  ;;  %176 = vrot.lane.b32.xlu1 %v554_v12, %s856_s12  ;;  %v75_v12 = vld [vmem:[#allocation7 + $0x70] sm:$0xff]  ;;  %p756_p4 = scmp.lt.s32.totalorder %s754_s18, %s750_s17 }
  0x34   :  { %v669_v14 = vpack.c.bf16 %v76_v13, %v75_v12 }
  0x35   :  { %652 = vmatpush3.bf16.msra.mxu0 %v651_v11  ;;  %661 = vmatpush3.bf16.msra.mxu1 %v660_v30  ;;  %v666_v11 = vpack.c.bf16 %v74_v10, %v73_v9  ;;  %p757_p5 = por %p756_p4, %p755_p3 }
  0x36   :  { %653 = vmatprep.subr.bf16.mxu0 %v852_v0  ;;  %662 = vmatprep.subr.bf16.mxu1 %v852_v0 }
  0x37   :  { %p758_p6 = pnand %p757_p5, %p751_p2 }
  0x39   :  { %655 = vmatpush3.bf16.msra.mxu0 %v654_v15  ;;  %v87_v15 = vld [vmem:[#allocation4] sm:$0x1] }
  0x3a   :  { %671 = vmatprep.subr.bf16.mxu0 %v852_v0 }
  0xa5   :  { %v97_v17 = vpop.permute.xlu0 %96 }
  0xa6   :  { %v100_v18 = vsel %vm99_vm2, %v88_v16, %v97_v17 }
  0xa7   :  { %605 = vmatmul.mubr.msk.f32.vlgmr.msra.gmra.mrb[0].mxu0 %vm101_vm3, %v100_v18  ;;  %v60_v18 = vld [vmem:[%s1033_s2] sm:$0x1]  ;;  %s857_s2 = smov 64  }
  0xa8   :  { %641 = vmatprep.mubr.msk.f32.mxu0 %vm853_vm0, %v854_v1  ;;  %61 = vst.msk [vmem:[#allocation3] sm:$0x1] %vm58_vm1, %v60_v18 }
  0xaf   :  { %v560_v26 = vld [vmem:[#allocation3] ss:$0 sm:$0xff] }
 0x17a   :  { %v171_v19 = vpop.f32.mrb[0].mxu0 }
 0x17b   :  { %692 = vtanh.f32 %v171_v19  ;;  %v606_v20 = vpop.f32.mrb[1].mxu0 }
 0x17c   :  { %v81_v20 = vld [vmem:[#allocation7 + $0xa0] sm:$0x1] }
 0x185   :  { %v693_v22 = vpop.eup %692 }
 0x186   :  { %v185_v23 = vmul.f32 %v693_v22, %v556_v21 }
 0x188   :  { %v186_v24 = vsel %vm99_vm2, %v185_v23, 0.0 }
 0x189   :  { %187 = vadd.xlane.f32.xlu0 %v186_v24 }
 0x216   :  { %v188_v31 = vpop.xlane.xlu0 %187 }
 0x217   :  { %v189_v32 = vrot.slane %v188_v31, 4 }
 0x219   :  { %v190_v33 = vmax.f32 %v188_v31, %v189_v32 }
 0x21b   :  { %v191_v34 = vrot.slane %v190_v33, 2 }
 0x21d   :  { %v192_v35 = vmax.f32 %v190_v33, %v191_v34 }
 0x21f   :  { %v193_v36 = vrot.slane %v192_v35, 1 }
 0x221   :  { %v194_v37 = vmax.f32 %v192_v35, %v193_v36 }
 0x223   :  { %v195_v38 = vsub.f32 %v188_v31, %v194_v37  ;;  %v82_v37 = vld [vmem:[#allocation7 + $0xb0] sm:$0xff] }
 0x225   :  { %v196_v39 = vmul.f32 1.442695, %v195_v38  ;;  %v83_v38 = vld [vmem:[#allocation7 + $0xb8] sm:$0xff] }
 0x227   :  { %694 = vpow2.f32 %v196_v39  ;;  %v84_v39 = vld [vmem:[#allocation7 + $0xc0] sm:$0xff] }
 0x231   :  { %v695_v40 = vpop.eup %694 }
 0x232   :  { %v198_v41 = vrot.slane %v695_v40, 4 }
 0x234   :  { %v199_v42 = vadd.f32 %v695_v40, %v198_v41  ;;  %v85_v41 = vld [vmem:[#allocation7 + $0xc8] sm:$0xff] }
 0x236   :  { %v200_v43 = vrot.slane %v199_v42, 2 }
 0x238   :  { %v201_v44 = vadd.f32 %v200_v43, %v199_v42  ;;  %v675_v42 = vpack.c.bf16 %v85_v41, %v84_v39 }
 0x23a   :  { %v202_v45 = vrot.slane %v201_v44, 1 }
 0x23c   :  { %v203_v46 = vadd.f32 %v202_v45, %v201_v44 }
 0x23e   :  { %696 = vrcp.f32 %v203_v46 }
 0x248   :  { %v697_v50 = vpop.eup %696 }
 0x249   :  { %v205_v51 = vmul.f32 %v697_v50, %v695_v40  ;;  %v672_v40 = vpack.c.bf16 %v83_v38, %v82_v37 }
 0x24b   :  { %v206_v52 = vmul.f32 %v205_v51, %v88_v16  ;;  %v474_v53 = vsel %vm473_vm4, %v205_v51, 0.0  ;;  %v177_v16 = vpop.permute.xlu1 %176  ;;  %673 = vmatpush3.bf16.msra.mxu0 %v672_v40 }
 0x24c   :  { %v476_v54 = vsel %vm475_vm5, %v474_v53, 0.0  ;;  %v180_v17 = vsel %vm179_vm7, %v87_v15, %v177_v16  ;;  %674 = vmatprep.subr.bf16.mxu0 %v852_v0 }
 0x24d   :  { %v207_v55 = vsel %vm99_vm2, %v206_v52, 0.0  ;;  %v477_v56 = vrot.slane %v476_v54, 4 }
 0x24e   :  { %v208_v57 = vrot.slane %v207_v55, 4 }
 0x24f   :  { %v478_v58 = vadd.f32 %v477_v56, %v476_v54  ;;  %676 = vmatpush3.bf16.msra.mxu0 %v675_v42 }
 0x250   :  { %v209_v59 = vadd.f32 %v208_v57, %v207_v55 }
 0x251   :  { %v479_v60 = vrot.slane %v478_v58, 2 }
 0x252   :  { %v210_v61 = vrot.slane %v209_v59, 2 }
 0x253   :  { %v480_v62 = vadd.f32 %v479_v60, %v478_v58 }
 0x254   :  { %v211_v63 = vadd.f32 %v210_v61, %v209_v59 }
 0x255   :  { %v481_v4 = vrot.slane %v480_v62, 1 }
 0x256   :  { %v212_v5 = vrot.slane %v211_v63, 1 }
 0x257   :  { %v482_v7 = vadd.f32 %v481_v4, %v480_v62 }
 0x258   :  { %v213_v8 = vadd.f32 %v212_v5, %v211_v63 }
 0x259   :  { %494 = vst.msk [vmem:[#allocation13] sm:$0x1] %vm493_vm6, %v482_v7 }
 0x25a   :  { %616 = vmatmul.mubr.msk.f32.vlgmr.msra.gmra.mrb[0].mxu1 %vm99_vm2, %v213_v8 }
 0x25b   :  { %664 = vmatpush3.bf16.msra.mxu1 %v663_v6  ;;  %630 = vmatprep.mubr.msk.f32.mxu1 %vm853_vm0, %v854_v1 }
 0x25c   :  { %665 = vmatprep.subr.bf16.mxu1 %v852_v0 }
 0x25f   :  { %667 = vmatpush3.bf16.msra.mxu1 %v666_v11 }
 0x260   :  { %668 = vmatprep.subr.bf16.mxu1 %v852_v0 }
 0x263   :  { %670 = vmatpush3.bf16.msra.mxu1 %v669_v14 }
 0x266   :  { %631 = vmatmul.mubr.msk.f32.vlgmr.msra.gmra.mrb[2].mxu1 %vm287_vm8, %v180_v17 }
 0x32d   :  { %v283_v1 = vpop.f32.mrb[0].mxu1 }
 0x32e   :  { %v617_v19 = vpop.f32.mrb[1].mxu1 }
 0x339   :  { %v357_v21 = vpop.f32.mrb[2].mxu1 }
 0x33a   :  { %v358_v22 = vadd.f32 %v357_v21, %v283_v1  ;;  %v632_v23 = vpop.f32.mrb[3].mxu1 }
 0x33c   :  { %v361_v24 = vadd.f32 %v358_v22, %v81_v20 }
 0x33e   :  { %698 = vtanh.f32 %v361_v24  ;;  %v559_v27 = vmul.f32 -1.442695, %v361_v24 }
 0x340   :  { %700 = vpow2.f32 %v559_v27 }
 0x348   :  { %v699_v25 = vpop.eup %698 }
 0x349   :  { %379 = vrot.lane.b32.xlu1 %v699_v25, %s855_s1 }
 0x34a   :  { %v701_v28 = vpop.eup %700 }
 0x34b   :  { %v365_v29 = vadd.f32 1.0, %v701_v28 }
 0x34d   :  { %374 = vrot.lane.b32.xlu1 %v560_v26, %s855_s1  ;;  %702 = vrcp.f32 %v365_v29 }
 0x357   :  { %v703_v30 = vpop.eup %702 }
 0x3bb   :  { %v380_v31 = vpop.permute.xlu1 %379 }
 0x3bc   :  { %v382_v32 = vmul.f32 %v703_v30, %v380_v31 }
 0x3be   :  { %384 = vrot.lane.b32.xlu1 %v382_v32, %s855_s1 }
 0x3bf   :  { %v375_v33 = vpop.permute.xlu1 %374 }
 0x3c0   :  { %v377_v34 = vmul.f32 %v703_v30, %v375_v33 }
 0x430   :  { %v385_v35 = vpop.permute.xlu1 %384 }
 0x431   :  { %v387_v36 = vadd.f32 %v385_v35, %v377_v34 }
 0x433   :  { %704 = vtanh.f32 %v387_v36 }
 0x43d   :  { %v705_v43 = vpop.eup %704 }
 0x43e   :  { %390 = vrot.lane.b32.xlu1 %v705_v43, %s855_s1 }
 0x4b0   :  { %v391_v44 = vpop.permute.xlu1 %390 }
 0x4b1   :  { %v393_v45 = vmul.f32 %v703_v30, %v391_v44 }
 0x4b3   :  { %395 = vrot.lane.b32.xlu1 %v393_v45, %s857_s2 }
 0x4b7   :  { %487 = vrot.lane.b32.xlu1 %v387_v36, %s858_s14 }
 0x525   :  { %v396_v46 = vpop.permute.xlu1 %395 }
 0x526   :  { %485 = vst.msk [vmem:[#allocation2] sm:$0x1] %vm58_vm1, %v396_v46  ;;  %495 = vst.msk [vmem:[#allocation10] sm:$0x1] %vm58_vm1, %v396_v46  ;;  %642 = vmatmul.mubr.msk.f32.vlgmr.msra.gmra.mrb[2].mxu0 %vm99_vm2, %v396_v46 }
 0x529   :  { %v488_v47 = vpop.permute.xlu1 %487 }
 0x52a   :  { %490 = vst.msk [vmem:[#allocation3] sm:$0x1] %vm58_vm1, %v488_v47  ;;  %496 = vst.msk [vmem:[#allocation12] sm:$0x1] %vm58_vm1, %v488_v47 }
 0x52b   :  { %761 = shalt.err (!%p758_p6)
}
 0x52c   :  { %s762_s21 = scalar_lea.hbm %s1037_s6, 16 }
 0x52d   :  { %p763_p7 = scmp.ne.s32.totalorder %s1037_s6, %s762_s21  ;;  %p766_p8 = scmp.lt.u32.totalorder %s762_s21, %s1037_s6 }
 0x52f   :  { %p768_p9 = pnand %p766_p8, %p763_p7 }
 0x531   :  { %771 = shalt.err (!%p768_p9)
}
 0x532   :  { %516 = dma.vmem_to_hbm [thread:$0]  %s514_s16, 16, %s1037_s6, [#allocation11]  }
 0x533   :  { %s860_s0 = smov [#allocation12]   ;;  %s861_s29 = smov [#allocation13]  }
 0x534   :  { %s523_s28 = sshll.u32 %s860_s0, 4  ;;  %s533_s9 = sshll.u32 %s861_s29, 4  ;;  %s524_s28 = int_to_ptr.vmem [resolvable:$true] %s523_s28  ;;  %s534_s9 = int_to_ptr.vmem [resolvable:$true] %s533_s9 }
 0x535   :  { %s772_s10 = scalar_lea.vmem %s524_s28, 16  ;;  %s776_s4 = scalar_lea.vmem %s524_s28, 32 }
 0x536   :  { %p773_p10 = scmp.ne.s32.totalorder %s524_s28, %s772_s10  ;;  %p777_p11 = scmp.lt.s32.totalorder %s524_s28, %s524_s28 }
 0x537   :  { %p778_p12 = scmp.lt.s32.totalorder %s776_s4, %s772_s10 }
 0x539   :  { %p779_p13 = por %p778_p12, %p777_p11 }
 0x53b   :  { %p780_p0 = pnand %p779_p13, %p773_p10 }
 0x53d   :  { %783 = shalt.err (!%p780_p0)
}
 0x53e   :  { %s784_s11 = scalar_lea.hbm %s1038_s7, 16 }
 0x53f   :  { %p785_p1 = scmp.ne.s32.totalorder %s1038_s7, %s784_s11  ;;  %p788_p2 = scmp.lt.u32.totalorder %s784_s11, %s1038_s7 }
 0x541   :  { %p790_p3 = pnand %p788_p2, %p785_p1 }
 0x543   :  { %793 = shalt.err (!%p790_p3)
}
 0x544   :  { %526 = dma.vmem_to_hbm [thread:$0]  %s524_s28, 16, %s1038_s7, [#allocation11]  }
 0x545   :  { %s794_s15 = scalar_lea.vmem %s534_s9, 16  ;;  %s798_s16 = scalar_lea.vmem %s534_s9, 32 }
 0x546   :  { %p795_p4 = scmp.ne.s32.totalorder %s534_s9, %s794_s15  ;;  %p799_p5 = scmp.lt.s32.totalorder %s534_s9, %s534_s9 }
 0x547   :  { %p800_p6 = scmp.lt.s32.totalorder %s798_s16, %s794_s15 }
 0x549   :  { %p801_p7 = por %p800_p6, %p799_p5 }
 0x54b   :  { %p802_p8 = pnand %p801_p7, %p795_p4 }
 0x54d   :  { %805 = shalt.err (!%p802_p8)
}
 0x54e   :  { %s806_s19 = scalar_lea.hbm %s1039_s8, 16 }
 0x54f   :  { %p807_p9 = scmp.ne.s32.totalorder %s1039_s8, %s806_s19  ;;  %p810_p10 = scmp.lt.u32.totalorder %s806_s19, %s1039_s8 }
 0x551   :  { %p812_p11 = pnand %p810_p10, %p807_p9 }
 0x553   :  { %815 = shalt.err (!%p812_p11)
}
 0x554   :  { %536 = dma.vmem_to_hbm [thread:$0]  %s534_s9, 16, %s1039_s8, [#allocation14]   ;;  %v86_v0 = vld [vmem:[#allocation7 + $0xd0] sm:$0x1]  ;;  %vm491_vm9 = vcmask 122880  }
 0x555   :  { %s862_s25 = smov [#allocation9]  }
 0x556   :  { %s503_s26 = sshll.u32 %s862_s25, 4  ;;  %s504_s26 = int_to_ptr.vmem [resolvable:$true] %s503_s26 }
 0x557   :  { %s816_s27 = scalar_lea.vmem %s504_s26, 16  ;;  %s820_s0 = scalar_lea.vmem %s504_s26, 32 }
 0x558   :  { %p817_p12 = scmp.ne.s32.totalorder %s504_s26, %s816_s27  ;;  %p821_p13 = scmp.lt.s32.totalorder %s504_s26, %s504_s26 }
 0x559   :  { %p822_p0 = scmp.lt.s32.totalorder %s820_s0, %s816_s27 }
 0x55b   :  { %p823_p1 = por %p822_p0, %p821_p13 }
 0x55d   :  { %p824_p2 = pnand %p823_p1, %p817_p12 }
 0x5f9   :  { %v465_v48 = vpop.f32.mrb[2].mxu0 }
 0x5fa   :  { %v466_v49 = vadd.f32 %v465_v48, %v86_v0  ;;  %v643_v50 = vpop.f32.mrb[3].mxu0 }
 0x5fc   :  { %492 = vst.msk [vmem:[#allocation9] sm:$0x1] %vm491_vm9, %v466_v49 }
 0x5fd   :  { %827 = shalt.err (!%p824_p2)
}
 0x5fe   :  { %s828_s8 = scalar_lea.hbm %s1036_s5, 16 }
 0x5ff   :  { %p829_p3 = scmp.ne.s32.totalorder %s1036_s5, %s828_s8  ;;  %p832_p4 = scmp.lt.u32.totalorder %s828_s8, %s1036_s5 }
 0x601   :  { %p834_p5 = pnand %p832_p4, %p829_p3 }
 0x603   :  { %837 = shalt.err (!%p834_p5)
}
 0x604   :  { %506 = dma.vmem_to_hbm [thread:$0]  %s504_s26, 16, %s1036_s5, [#allocation6]  }
 0x605   :  { %842 = dma.done.wait [#allocation6], 16  }
 0x606   :  { %843 = vsyncadd [#allocation6], 4294967280 }
 0x607   :  { %844 = dma.done.wait [#allocation11], 32  }
 0x608   :  { %845 = vsyncadd [#allocation11], 4294967264 }
 0x609   :  { %846 = dma.done.wait [#allocation14], 16  }
 0x60a   :  { %847 = vsyncadd [#allocation14], 4294967280 }
 0x60b   :  { %549 = vsyncpa [#allocation5], 1 }
 0x60c   :  { %550 = vsyncpa [#allocation8], 1 }
 0x60d   :  { %551 = vsyncpa [#allocation6], 1 }
 0x60e   :  { %552 = vsyncpa [#allocation11], 1 }
 0x60f   :  { %553 = vsyncpa [#allocation14], 1 }

</bundles_post_ra>
